<compile_context>
chip_gen: v6e
topology: v6e:2x2x1
jax: 0.10.0
libtpu: 0.0.40
codegen_flags: <defaults>
</compile_context>

<pallas_src>
import jax
import jax.numpy as jnp
from jax.experimental import pallas as pl
from jax.experimental.pallas import tpu as pltpu

# ---------------------------------------------------------------------------
# Problem sizes (small, consistent with the module's forward)
# ---------------------------------------------------------------------------
N, C_IN, H, W = 2, 4, 16, 16          # input  (NCHW in PyTorch convention)
C_OUT = 8                             # out_channels
KH = KW = 3                           # kernel_size
PAD = 1                               # padding
EPS = 1e-5                            # nn.BatchNorm2d default eps

KK = C_IN * KH * KW                   # 36   (im2col contraction dim)
HW = H * W                            # 256  (per-image spatial, lane axis)
M = N * HW                            # 512  (total BN samples per channel)
WCOLS = KK + 4                        # 40: cols 36/37 = gamma hi/lo, 38/39 = beta hi/lo


# ---------------------------------------------------------------------------
# Pallas kernel: per-batch im2col matmuls + fused batch-norm + ReLU
# ---------------------------------------------------------------------------
def _cbr_kernel(w_ref, p_ref, o_ref):
    # w_ref : (C_OUT, 40) bf16  cols 0..35 conv weight (c_in, kh, kw order),
    #                           col 36/37 gamma hi/lo, col 38/39 beta hi/lo
    # p_ref : (N, KK, HW) bf16  im2col patches per batch element, lanes = h*w
    # o_ref : (N, C_OUT, HW) f32  NCHW-friendly output slab (256-lane stores)
    w = w_ref[:, 0:KK]                                          # (8, 36) bf16 view

    # one MXU matmul per batch element, f32 accumulation
    accs = [jnp.dot(w, p_ref[n], preferred_element_type=jnp.float32)  # (8, 256)
            for n in range(N)]

    # BatchNorm2d (training mode): per-channel mean / biased variance over all
    # N*H*W samples.  Two-pass (centered) variance to avoid cancellation.
    inv_m = 1.0 / float(M)
    mean = sum(jnp.sum(a, axis=1, keepdims=True) for a in accs) * inv_m  # (8,1)
    cs = [a - mean for a in accs]
    var = sum(jnp.sum(c * c, axis=1, keepdims=True) for c in cs) * inv_m # (8,1)

    # recover f32 gamma/beta from bf16 hi/lo pairs packed in the weight tile
    gamma = (w_ref[:, KK:KK + 1].astype(jnp.float32)
             + w_ref[:, KK + 1:KK + 2].astype(jnp.float32))              # (8,1)
    beta = (w_ref[:, KK + 2:KK + 3].astype(jnp.float32)
            + w_ref[:, KK + 3:KK + 4].astype(jnp.float32))               # (8,1)

    scale = gamma * jax.lax.rsqrt(var + EPS)                             # (8,1)

    # affine BN + ReLU, per-batch unmasked 256-lane stores
    for n in range(N):
        o_ref[n] = jnp.maximum(cs[n] * scale + beta, 0.0)


# ---------------------------------------------------------------------------
# Wrapper: single-op im2col + pallas_call + free reshape back to NCHW
# ---------------------------------------------------------------------------
@jax.jit
def cbr_forward(x_nchw, w_oihw, bias, gamma, beta):
    """x_nchw: (N, C_IN, H, W) float32 -> (N, C_OUT, H, W) float32.

    `bias` is accepted for API parity but intentionally unused: a per-channel
    conv bias cancels exactly under training-mode BatchNorm mean subtraction.
    """
    del bias  # cancels under BN (training mode)

    # im2col in one XLA op: (N, C_IN*KH*KW, H, W), feature order (c_in, kh, kw)
    patches = jax.lax.conv_general_dilated_patches(
        x_nchw,
        filter_shape=(KH, KW),
        window_strides=(1, 1),
        padding=((PAD, PAD), (PAD, PAD)),
        dimension_numbers=("NCHW", "OIHW", "NCHW"),
    )                                                     # (N, 36, H, W)
    p = patches.reshape(N, KK, HW).astype(jnp.bfloat16)   # (2, 36, 256) bf16

    # weight tile: conv weights + gamma/beta (bf16 hi/lo split keeps f32 info)
    w36 = w_oihw.reshape(C_OUT, KK).astype(jnp.bfloat16)                # (8, 36)
    g_hi = gamma.astype(jnp.bfloat16)
    g_lo = (gamma - g_hi.astype(jnp.float32)).astype(jnp.bfloat16)
    b_hi = beta.astype(jnp.bfloat16)
    b_lo = (beta - b_hi.astype(jnp.float32)).astype(jnp.bfloat16)
    w_tile = jnp.concatenate(
        [w36, g_hi[:, None], g_lo[:, None], b_hi[:, None], b_lo[:, None]],
        axis=1)                                                         # (8, 40)

    out = pl.pallas_call(
        _cbr_kernel,
        out_shape=jax.ShapeDtypeStruct((N, C_OUT, HW), jnp.float32),
        grid_spec=pl.GridSpec(
            grid=(1,),
            in_specs=[
                pl.BlockSpec((C_OUT, WCOLS), lambda i: (0, 0)),
                pl.BlockSpec((N, KK, HW), lambda i: (0, 0, 0)),
            ],
            out_specs=pl.BlockSpec((N, C_OUT, HW), lambda i: (0, 0, 0)),
        ),
        compiler_params=pltpu.CompilerParams(
            dimension_semantics=("arbitrary",)
        ),
    )(w_tile, p)

    # (N, C_OUT, H*W) -> (N, C_OUT, H, W): free reshape, no transpose
    return out.reshape(N, C_OUT, H, W)


# ---------------------------------------------------------------------------
# Pure-JAX reference (keeps the conv bias explicitly)
# ---------------------------------------------------------------------------
def cbr_reference(x_nchw, w_oihw, bias, gamma, beta):
    conv = jax.lax.conv_general_dilated(
        x_nchw, w_oihw,
        window_strides=(1, 1),
        padding=((PAD, PAD), (PAD, PAD)),
        dimension_numbers=("NCHW", "OIHW", "NCHW"),
    ) + bias.reshape(1, C_OUT, 1, 1)
    mean = jnp.mean(conv, axis=(0, 2, 3), keepdims=True)
    var = jnp.mean((conv - mean) ** 2, axis=(0, 2, 3), keepdims=True)
    y = (conv - mean) * jax.lax.rsqrt(var + EPS)
    y = y * gamma.reshape(1, C_OUT, 1, 1) + beta.reshape(1, C_OUT, 1, 1)
    return jnp.maximum(y, 0.0)


if __name__ == "__main__":
    key = jax.random.PRNGKey(0)
    kx, kw_, kb = jax.random.split(key, 3)

    # deterministic synthetic parameters (shapes from CBR.__init__)
    x = jax.random.normal(kx, (N, C_IN, H, W), dtype=jnp.float32)
    fan_in = C_IN * KH * KW
    bound = 1.0 / (fan_in ** 0.5)
    w = jax.random.uniform(kw_, (C_OUT, C_IN, KH, KW),
                           minval=-bound, maxval=bound, dtype=jnp.float32)
    b = jax.random.uniform(kb, (C_OUT,),
                           minval=-bound, maxval=bound, dtype=jnp.float32)
    gamma = jnp.ones((C_OUT,), jnp.float32)   # BatchNorm weight init
    beta = jnp.zeros((C_OUT,), jnp.float32)   # BatchNorm bias init

    out = cbr_forward(x, w, b, gamma, beta)
    out = jax.block_until_ready(out)
    assert out.shape == (N, C_OUT, H, W)

    # Tight structural check: the kernel intentionally feeds the MXU bf16
    # operands (f32 accumulation), so compare against an f32 reference run on
    # the same bf16-quantized conv inputs.  Remaining differences are only
    # summation order + the (exactly cancelling) dropped conv bias.
    xq = x.astype(jnp.bfloat16).astype(jnp.float32)
    wq = w.astype(jnp.bfloat16).astype(jnp.float32)
    ref = cbr_reference(xq, wq, b, gamma, beta)
    assert jnp.allclose(out, ref, atol=1e-4, rtol=1e-4), "mismatch vs reference"

    print("KERNEL_OK")
</pallas_src>

<mosaic_0001>
module attributes {stable_mosaic.version = 11 : i64} {
  func.func @_cbr_kernel(%arg0: i32, %arg1: memref<8x40xbf16, #tpu.memory_space<vmem>>, %arg2: memref<2x36x256xbf16, #tpu.memory_space<vmem>>, %arg3: memref<2x8x256xf32, #tpu.memory_space<vmem>>) attributes {dimension_semantics = [#tpu.dimension_semantics<arbitrary>], iteration_bounds = array<i64: 1>, scalar_prefetch = 0 : i64, scratch_operands = 0 : i64, tpu.core_type = #tpu.core_type<tc>, window_params = [{pipeline_mode = #tpu.pipeline_mode<synchronous>, transform_indices = @transform_0, window_bounds = array<i64: 8, 40>}, {pipeline_mode = #tpu.pipeline_mode<synchronous>, transform_indices = @transform_1, window_bounds = array<i64: 2, 36, 256>}, {pipeline_mode = #tpu.pipeline_mode<synchronous>, transform_indices = @transform_2, window_bounds = array<i64: 2, 8, 256>}]} {
    %c0 = arith.constant 0 : index
    %c0_0 = arith.constant 0 : index
    %0 = vector.load %arg1[%c0, %c0_0] : memref<8x40xbf16, #tpu.memory_space<vmem>>, vector<8x36xbf16>
    %c0_1 = arith.constant 0 : index
    %c0_2 = arith.constant 0 : index
    %c0_3 = arith.constant 0 : index
    %1 = vector.load %arg2[%c0_1, %c0_2, %c0_3] : memref<2x36x256xbf16, #tpu.memory_space<vmem>>, vector<1x36x256xbf16>
    %2 = vector.shape_cast %1 : vector<1x36x256xbf16> to vector<36x256xbf16>
    %cst = arith.constant dense<0.000000e+00> : vector<8x256xf32>
    %3 = tpu.matmul %0, %2, %cst {dimension_numbers = #tpu.dot_dimension_numbers<[1], [0], [0], [1], [0, 0, 1, 1], [], []>} : vector<8x36xbf16>, vector<36x256xbf16>, vector<8x256xf32> -> vector<8x256xf32>
    %c1 = arith.constant 1 : index
    %c0_4 = arith.constant 0 : index
    %c0_5 = arith.constant 0 : index
    %4 = vector.load %arg2[%c1, %c0_4, %c0_5] : memref<2x36x256xbf16, #tpu.memory_space<vmem>>, vector<1x36x256xbf16>
    %5 = vector.shape_cast %4 : vector<1x36x256xbf16> to vector<36x256xbf16>
    %cst_6 = arith.constant dense<0.000000e+00> : vector<8x256xf32>
    %6 = tpu.matmul %0, %5, %cst_6 {dimension_numbers = #tpu.dot_dimension_numbers<[1], [0], [0], [1], [0, 0, 1, 1], [], []>} : vector<8x36xbf16>, vector<36x256xbf16>, vector<8x256xf32> -> vector<8x256xf32>
    %cst_7 = arith.constant dense<0.000000e+00> : vector<8xf32>
    %7 = vector.multi_reduction <add>, %3, %cst_7 [1] : vector<8x256xf32> to vector<8xf32>
    %8 = vector.shape_cast %7 : vector<8xf32> to vector<8x1xf32>
    %cst_8 = arith.constant 0.000000e+00 : f32
    %9 = vector.broadcast %cst_8 : f32 to vector<8x1xf32>
    %10 = arith.addf %9, %8 : vector<8x1xf32>
    %cst_9 = arith.constant dense<0.000000e+00> : vector<8xf32>
    %11 = vector.multi_reduction <add>, %6, %cst_9 [1] : vector<8x256xf32> to vector<8xf32>
    %12 = vector.shape_cast %11 : vector<8xf32> to vector<8x1xf32>
    %13 = arith.addf %10, %12 : vector<8x1xf32>
    %cst_10 = arith.constant 0.001953125 : f32
    %14 = vector.broadcast %cst_10 : f32 to vector<8x1xf32>
    %15 = arith.mulf %13, %14 : vector<8x1xf32>
    %16 = vector.broadcast %15 : vector<8x1xf32> to vector<8x256xf32>
    %17 = arith.subf %3, %16 : vector<8x256xf32>
    %18 = vector.broadcast %15 : vector<8x1xf32> to vector<8x256xf32>
    %19 = arith.subf %6, %18 : vector<8x256xf32>
    %20 = arith.mulf %17, %17 : vector<8x256xf32>
    %cst_11 = arith.constant dense<0.000000e+00> : vector<8xf32>
    %21 = vector.multi_reduction <add>, %20, %cst_11 [1] : vector<8x256xf32> to vector<8xf32>
    %22 = vector.shape_cast %21 : vector<8xf32> to vector<8x1xf32>
    %cst_12 = arith.constant 0.000000e+00 : f32
    %23 = vector.broadcast %cst_12 : f32 to vector<8x1xf32>
    %24 = arith.addf %23, %22 : vector<8x1xf32>
    %25 = arith.mulf %19, %19 : vector<8x256xf32>
    %cst_13 = arith.constant dense<0.000000e+00> : vector<8xf32>
    %26 = vector.multi_reduction <add>, %25, %cst_13 [1] : vector<8x256xf32> to vector<8xf32>
    %27 = vector.shape_cast %26 : vector<8xf32> to vector<8x1xf32>
    %28 = arith.addf %24, %27 : vector<8x1xf32>
    %cst_14 = arith.constant 0.001953125 : f32
    %29 = vector.broadcast %cst_14 : f32 to vector<8x1xf32>
    %30 = arith.mulf %28, %29 : vector<8x1xf32>
    %c0_15 = arith.constant 0 : index
    %c36 = arith.constant 36 : index
    %31 = vector.load %arg1[%c0_15, %c36] : memref<8x40xbf16, #tpu.memory_space<vmem>>, vector<8x1xbf16>
    %32 = arith.extf %31 : vector<8x1xbf16> to vector<8x1xf32>
    %c0_16 = arith.constant 0 : index
    %c37 = arith.constant 37 : index
    %33 = vector.load %arg1[%c0_16, %c37] : memref<8x40xbf16, #tpu.memory_space<vmem>>, vector<8x1xbf16>
    %34 = arith.extf %33 : vector<8x1xbf16> to vector<8x1xf32>
    %35 = arith.addf %32, %34 : vector<8x1xf32>
    %c0_17 = arith.constant 0 : index
    %c38 = arith.constant 38 : index
    %36 = vector.load %arg1[%c0_17, %c38] : memref<8x40xbf16, #tpu.memory_space<vmem>>, vector<8x1xbf16>
    %37 = arith.extf %36 : vector<8x1xbf16> to vector<8x1xf32>
    %c0_18 = arith.constant 0 : index
    %c39 = arith.constant 39 : index
    %38 = vector.load %arg1[%c0_18, %c39] : memref<8x40xbf16, #tpu.memory_space<vmem>>, vector<8x1xbf16>
    %39 = arith.extf %38 : vector<8x1xbf16> to vector<8x1xf32>
    %40 = arith.addf %37, %39 : vector<8x1xf32>
    %cst_19 = arith.constant 9.99999974E-6 : f32
    %41 = vector.broadcast %cst_19 : f32 to vector<8x1xf32>
    %42 = arith.addf %30, %41 : vector<8x1xf32>
    %43 = math.rsqrt %42 : vector<8x1xf32>
    %44 = arith.mulf %35, %43 : vector<8x1xf32>
    %45 = vector.broadcast %44 : vector<8x1xf32> to vector<8x256xf32>
    %46 = arith.mulf %17, %45 : vector<8x256xf32>
    %47 = vector.broadcast %40 : vector<8x1xf32> to vector<8x256xf32>
    %48 = arith.addf %46, %47 : vector<8x256xf32>
    %cst_20 = arith.constant 0.000000e+00 : f32
    %49 = vector.broadcast %cst_20 : f32 to vector<8x256xf32>
    %50 = arith.maximumf %48, %49 : vector<8x256xf32>
    %c0_21 = arith.constant 0 : index
    %c0_22 = arith.constant 0 : index
    %c0_23 = arith.constant 0 : index
    %51 = vector.load %arg3[%c0_21, %c0_22, %c0_23] : memref<2x8x256xf32, #tpu.memory_space<vmem>>, vector<1x8x256xf32>
    %52 = vector.shape_cast %51 : vector<1x8x256xf32> to vector<8x256xf32>
    %53 = vector.shape_cast %50 : vector<8x256xf32> to vector<1x8x256xf32>
    tpu.vector_store %arg3[%c0_21, %c0_22, %c0_23], %53 {strides = array<i32>} : memref<2x8x256xf32, #tpu.memory_space<vmem>>, vector<1x8x256xf32>,
    %54 = vector.broadcast %44 : vector<8x1xf32> to vector<8x256xf32>
    %55 = arith.mulf %19, %54 : vector<8x256xf32>
    %56 = vector.broadcast %40 : vector<8x1xf32> to vector<8x256xf32>
    %57 = arith.addf %55, %56 : vector<8x256xf32>
    %cst_24 = arith.constant 0.000000e+00 : f32
    %58 = vector.broadcast %cst_24 : f32 to vector<8x256xf32>
    %59 = arith.maximumf %57, %58 : vector<8x256xf32>
    %c1_25 = arith.constant 1 : index
    %c0_26 = arith.constant 0 : index
    %c0_27 = arith.constant 0 : index
    %60 = vector.load %arg3[%c1_25, %c0_26, %c0_27] : memref<2x8x256xf32, #tpu.memory_space<vmem>>, vector<1x8x256xf32>
    %61 = vector.shape_cast %60 : vector<1x8x256xf32> to vector<8x256xf32>
    %62 = vector.shape_cast %59 : vector<8x256xf32> to vector<1x8x256xf32>
    tpu.vector_store %arg3[%c1_25, %c0_26, %c0_27], %62 {strides = array<i32>} : memref<2x8x256xf32, #tpu.memory_space<vmem>>, vector<1x8x256xf32>,
    return
  }
  func.func @transform_0(%arg0: i32) -> (i32, i32) {
    %c0_i32 = arith.constant 0 : i32
    %c0_i32_0 = arith.constant 0 : i32
    %c0_i32_1 = arith.constant 0 : i32
    return %c0_i32, %c0_i32_0 : i32, i32
  }
  func.func @transform_1(%arg0: i32) -> (i32, i32, i32) {
    %c0_i32 = arith.constant 0 : i32
    %c0_i32_0 = arith.constant 0 : i32
    %c0_i32_1 = arith.constant 0 : i32
    %c0_i32_2 = arith.constant 0 : i32
    return %c0_i32, %c0_i32_0, %c0_i32_1 : i32, i32, i32
  }
  func.func @transform_2(%arg0: i32) -> (i32, i32, i32) {
    %c0_i32 = arith.constant 0 : i32
    %c0_i32_0 = arith.constant 0 : i32
    %c0_i32_1 = arith.constant 0 : i32
    %c0_i32_2 = arith.constant 0 : i32
    return %c0_i32, %c0_i32_0, %c0_i32_1 : i32, i32, i32
  }
}

</mosaic_0001>

<bundles_post_ra>
// kernel: cbr_forward.1
= control target key start
LH: loop header
LB: loop body
LE: loop exit
PB: predicated region body
PF: predicated region fallthrough
CT: control target
= control target key end

     0   :  { %vm47_vm0 = vcmask 1041408   ;;  %v287_v2 = vmov 0   ;;  %vm43_vm1 = vcmask 293888   ;;  %v289_v43 = vmov 36   ;;  %s351_s1 = inlined_call_operand.vmem [shape: bf16[2,36,256], index: 1, kind: input, shape index: {}]   ;;  %s352_s0 = inlined_call_operand.vmem [shape: bf16[8,40], index: 0, kind: input, shape index: {}]   ;;  %s353_s2 = inlined_call_operand.vmem [shape: f32[2,8,256], index: 2, kind: output, shape index: {}]  }
   0x1   :  { %v17_v0 = vld [vmem:[%s351_s1 + $0x20] sm:$0x33]  ;;  %v251_v1 = vld [vmem:[%s351_s1 + $0x48] sm:$0x33]  ;;  %86 = vmatprep.mubr.bf16.mxu0 %v287_v2  ;;  %164 = vmatprep.mubr.bf16.mxu1 %v287_v2  ;;  %v273_v7 = vld [vmem:[%s351_s1 + $0x14] ss:$8 sps:$4 sm:$0xff]  }
   0x2   :  { %v244_v3 = vcombine.high %v17_v0, %v17_v0  ;;  %v257_v4 = vcombine.high %v251_v1, %v251_v1  ;;  %v243_v5 = vcombine.low %v17_v0, %v17_v0  ;;  %v256_v6 = vcombine.low %v251_v1, %v251_v1  ;;  %v275_v8 = vld [vmem:[%s351_s1 + $0x3c] ss:$8 sps:$4 sm:$0xff]   ;;  %v277_v11 = vld [vmem:[%s351_s1 + $0x10] ss:$8 sps:$4 sm:$0xff]   ;;  %v281_v14 = vld [vmem:[%s351_s1 + $0x2c] ss:$8 sps:$4 sm:$0xff]   ;;  %266 = vset.pattern.permute.xlu1 %v289_v43 }
   0x3   :  { %v278_v12 = vld [vmem:[%s351_s1 + $0x38] ss:$8 sps:$4 sm:$0xff]   ;;  %v279_v13 = vld [vmem:[%s351_s1 + $0x4] ss:$8 sps:$4 sm:$0xff]   ;;  %v284_v16 = vld [vmem:[%s351_s1 + $0x28] ss:$8 sps:$4 sm:$0xff]  }
   0x4   :  { %245 = vmatprep.subr.msk.bf16.mxu0 %vm47_vm0, %v244_v3  ;;  %258 = vmatprep.subr.msk.bf16.mxu1 %vm47_vm0, %v257_v4  ;;  %v49_v9 = vsel %vm47_vm0, %v243_v5, 0  ;;  %v127_v10 = vsel %vm47_vm0, %v256_v6, 0  ;;  %v283_v15 = vld [vmem:[%s351_s1] ss:$8 sps:$4 sm:$0xff]   ;;  %s288_s1 = smov 127   ;;  %v290_v44 = vmov 38  }
   0x5   :  { %65 = vmatpush1.bf16.msra.mxu0 %v49_v9  ;;  %143 = vmatpush1.bf16.msra.mxu1 %v127_v10  ;;  %v12_v17 = vld [vmem:[%s352_s0] sm:$0xf] }
   0x6   :  { %66 = vmatprep.subr.bf16.mxu0 %v273_v7  ;;  %144 = vmatprep.subr.bf16.mxu1 %v275_v8  ;;  %v199_v28 = vunpack.c.l.bf16 %v12_v17 }
   0x7   :  { %268 = vset.pattern.permute.xlu0 %v290_v44 }
   0x9   :  { %67 = vmatpush1.bf16.msra.mxu0 %v277_v11  ;;  %145 = vmatpush1.bf16.msra.mxu1 %v278_v12 }
   0xa   :  { %68 = vmatprep.subr.bf16.mxu0 %v279_v13  ;;  %146 = vmatprep.subr.bf16.mxu1 %v281_v14 }
   0xd   :  { %69 = vmatpush1.bf16.msra.mxu0 %v283_v15  ;;  %147 = vmatpush1.bf16.msra.mxu1 %v284_v16 }
  0x10   :  { %246 = vmatmul.mubr.msk.bf16.vlgmr.msra.gmra.mxu0 %vm43_vm1, %v12_v17  ;;  %259 = vmatmul.mubr.msk.bf16.vlgmr.msra.gmra.mxu1 %vm43_vm1, %v12_v17 }
  0xd0   :  { %v88_v18 = vpop.f32.mrf.mxu0  ;;  %v166_v19 = vpop.f32.mrf.mxu1 }
  0xd2   :  { %v90_v20 = vpop.f32.mrf.mxu0  ;;  %v168_v21 = vpop.f32.mrf.mxu1 }
  0xd3   :  { %v173_v22 = vadd.f32 %v90_v20, %v88_v18  ;;  %v177_v27 = vadd.f32 %v168_v21, %v166_v19 }
  0xd4   :  { %v92_v23 = vpop.f32.mrf.mxu0  ;;  %v170_v24 = vpop.f32.mrf.mxu1 }
  0xd5   :  { %174 = vadd.xlane.f32.xlu0 %v173_v22 }
  0xd6   :  { %v93_v25 = vpop.f32.mrf.mxu0  ;;  %v171_v26 = vpop.f32.mrf.mxu1 }
  0xd9   :  { %178 = vadd.xlane.f32.xlu0 %v177_v27 }
  0xef   :  { %201 = vrot.lane.b32.xlu0 %v199_v28, %s288_s1 }
 0x15e   :  { %v175_v29 = vpop.xlane.xlu0 %174 }
 0x162   :  { %v179_v30 = vpop.xlane.xlu0 %178 }
 0x163   :  { %v180_v31 = vadd.f32 %v179_v30, %v175_v29 }
 0x165   :  { %v181_v32 = vmul.f32 0.001953125, %v180_v31 }
 0x166   :  { %v202_v50 = vpop.permute.xlu0 %201 }
 0x167   :  { %v182_v33 = vsub.f32 %v88_v18, %v181_v32  ;;  %v183_v34 = vsub.f32 %v90_v20, %v181_v32  ;;  %v184_v35 = vsub.f32 %v166_v19, %v181_v32  ;;  %v185_v36 = vsub.f32 %v168_v21, %v181_v32 }
 0x168   :  { %v204_v51 = vadd.f32 %v202_v50, %v199_v28 }
 0x169   :  { %v186_v37 = vmul.f32 %v182_v33, %v182_v33  ;;  %v187_v38 = vmul.f32 %v183_v34, %v183_v34  ;;  %v192_v40 = vmul.f32 %v184_v35, %v184_v35  ;;  %v193_v41 = vmul.f32 %v185_v36, %v185_v36 }
 0x16b   :  { %v188_v39 = vadd.f32 %v187_v38, %v186_v37  ;;  %v194_v42 = vadd.f32 %v193_v41, %v192_v40 }
 0x16d   :  { %189 = vadd.xlane.f32.xlu1 %v188_v39 }
 0x171   :  { %195 = vadd.xlane.f32.xlu1 %v194_v42 }
 0x1f6   :  { %v190_v45 = vpop.xlane.xlu1 %189 }
 0x1fa   :  { %v196_v46 = vpop.xlane.xlu1 %195 }
 0x1fb   :  { %v197_v47 = vadd.f32 %v196_v46, %v190_v45 }
 0x1fd   :  { %v198_v48 = vmul.f32 0.001953125, %v197_v47 }
 0x1ff   :  { %v205_v49 = vadd.f32 1e-05, %v198_v48 }
 0x201   :  { %285 = vrsqrt.f32 %v205_v49 }
 0x20e   :  { %v286_v52 = vpop.eup %285 }
 0x20f   :  { %v207_v53 = vmul.f32 %v286_v52, %v204_v51 }
 0x211   :  { %210 = vperm.xlu1 %266, %v207_v53  }
 0x215   :  { %267 = vset.pattern.permute.xlu1 %v290_v44 }
 0x216   :  { %217 = vperm.xlu1 %267, %v204_v51  }
 0x28c   :  { %v211_v54 = vpop.permute.xlu1 %210 }
 0x28d   :  { %v213_v55 = vmul.f32 %v211_v54, %v182_v33  ;;  %v214_v56 = vmul.f32 %v211_v54, %v183_v34  ;;  %v226_v57 = vmul.f32 %v211_v54, %v184_v35  ;;  %v227_v58 = vmul.f32 %v211_v54, %v185_v36 }
 0x291   :  { %v218_v59 = vpop.permute.xlu1 %217 }
 0x292   :  { %v220_v60 = vadd.f32 %v218_v59, %v213_v55  ;;  %v221_v61 = vadd.f32 %v218_v59, %v214_v56  ;;  %v228_v62 = vadd.f32 %v226_v57, %v218_v59  ;;  %v229_v63 = vadd.f32 %v227_v58, %v218_v59 }
 0x294   :  { %v222_v0 = vmax.f32 %v220_v60, 0.0  ;;  %v223_v1 = vmax.f32 %v221_v61, 0.0  ;;  %v230_v2 = vmax.f32 %v228_v62, 0.0  ;;  %v231_v3 = vmax.f32 %v229_v63, 0.0 }
 0x296   :  { %224 = vst [vmem:[%s353_s2] sm:$0xff] %v222_v0  ;;  %225 = vst [vmem:[%s353_s2 + $0x8] sm:$0xff] %v223_v1 }
 0x297   :  { %260 = vst [vmem:[%s353_s2 + $0x10] sm:$0xff] %v230_v2  ;;  %261 = vst [vmem:[%s353_s2 + $0x18] sm:$0xff] %v231_v3 }

</bundles_post_ra>
